<compile_context>
chip_gen: v7x
topology: tpu7x:2x2x1
jax: 0.10.0
libtpu: 0.0.40
codegen_flags: <defaults>
</compile_context>

<pallas_src>
import functools

import jax
import jax.numpy as jnp
from jax.experimental import pallas as pl
from jax.experimental.pallas import tpu as pltpu


def _round_up(n: int, m: int) -> int:
    return ((n + m - 1) // m) * m


def _mlp_kernel(x_ref, w1_ref, b1_ref, w2_ref, b2_ref, w3_ref, b3_ref, o_ref):
    # x tile: (tb, states) f32 from HBM; cast to bf16 in-kernel (free filler).
    x = x_ref[...].astype(jnp.bfloat16)

    # fc1 + ReLU : (tb, S) @ (S, Hp) -> (tb, Hp); f32 accumulate, f32 epilogue.
    h1 = jnp.dot(x, w1_ref[...], preferred_element_type=jnp.float32)
    h1 = jnp.maximum(h1 + b1_ref[...], 0.0)

    # fc2 + ReLU : (tb, Hp) @ (Hp, Sp) -> (tb, Sp)
    h2 = jnp.dot(h1.astype(jnp.bfloat16), w2_ref[...],
                 preferred_element_type=jnp.float32)
    h2 = jnp.maximum(h2 + b2_ref[...], 0.0)

    # fc3 (no activation) : (tb, Sp) @ (Sp, output) -> (tb, output), unpadded.
    h3 = jnp.dot(h2.astype(jnp.bfloat16), w3_ref[...],
                 preferred_element_type=jnp.float32)
    o_ref[...] = (h3 + b3_ref[...]).astype(o_ref.dtype)


def prepare_params(params):
    """One-time preprocessing of PyTorch-convention params (hoisted out of the
    per-call path): transpose to (in, out), pad *internal* dims to 128 lanes,
    cast matmul operands to bf16. Padding is mathematically inert (zero
    weights/biases, ReLU(0)=0) and never touches the kernel's HBM-facing
    input/output layouts."""
    w1, b1 = params["w1"], params["b1"]   # (H, S), (H,)
    w2, b2 = params["w2"], params["b2"]   # (S, H), (S,)
    w3, b3 = params["w3"], params["b3"]   # (O, S), (O,)

    hidden, states = w1.shape
    output = w3.shape[0]
    Hp = _round_up(hidden, 128)
    Sp = _round_up(states, 128)

    f32, bf16 = jnp.float32, jnp.bfloat16

    w1t = jnp.zeros((states, Hp), bf16).at[:, :hidden].set(w1.T.astype(bf16))
    w2t = jnp.zeros((Hp, Sp), bf16).at[:hidden, :states].set(w2.T.astype(bf16))
    w3t = jnp.zeros((Sp, output), bf16).at[:states, :].set(w3.T.astype(bf16))
    b1p = jnp.zeros((1, Hp), f32).at[0, :hidden].set(b1.astype(f32))
    b2p = jnp.zeros((1, Sp), f32).at[0, :states].set(b2.astype(f32))
    b3p = b3.astype(f32).reshape(1, output)

    return {"w1t": w1t, "b1p": b1p, "w2t": w2t, "b2p": b2p,
            "w3t": w3t, "b3p": b3p}


def _choose_tb(batch, states, Hp, Sp, output, block_b):
    """Batch tile: >= 8 sublanes, >= 2 grid steps when possible (v7x megacore),
    capped by block_b and by a conservative VMEM budget."""
    if batch <= 8:
        return batch  # single partial/whole tile; block dim == full array dim
    tb = min(block_b, _round_up(pl.cdiv(batch, 2), 8))
    # Double-buffered x & out tiles + live f32 intermediates, per row.
    bytes_per_row = (2 * 2 * states        # bf16 x tile, 2 buffers
                     + 2 * 4 * output      # f32 out tile, 2 buffers
                     + 4 * (Hp + Sp))      # f32 h1 / h2 live values
    budget = 40 * 1024 * 1024              # leaves headroom under 48 MiB limit
    tb_cap = max(8, (budget // bytes_per_row) // 8 * 8)
    return max(8, min(tb, tb_cap))


@functools.partial(jax.jit, static_argnames=("block_b",))
def mlp_forward(x, prepared, *, block_b: int = 2048):
    """x: (batch, states) float32; prepared: output of prepare_params()."""
    batch, states = x.shape
    w1t, b1p = prepared["w1t"], prepared["b1p"]
    w2t, b2p = prepared["w2t"], prepared["b2p"]
    w3t, b3p = prepared["w3t"], prepared["b3p"]
    Hp = w1t.shape[1]
    Sp = w2t.shape[1]
    output = w3t.shape[1]

    tb = _choose_tb(batch, states, Hp, Sp, output, block_b)
    grid = (pl.cdiv(batch, tb),)   # no batch padding; last tile may be partial

    return pl.pallas_call(
        _mlp_kernel,
        out_shape=jax.ShapeDtypeStruct((batch, output), jnp.float32),
        grid_spec=pltpu.PrefetchScalarGridSpec(
            num_scalar_prefetch=0,
            grid=grid,
            in_specs=[
                pl.BlockSpec((tb, states), lambda i: (i, 0)),   # x (pipelined)
                pl.BlockSpec((states, Hp), lambda i: (0, 0)),   # w1 (resident)
                pl.BlockSpec((1, Hp), lambda i: (0, 0)),        # b1
                pl.BlockSpec((Hp, Sp), lambda i: (0, 0)),       # w2
                pl.BlockSpec((1, Sp), lambda i: (0, 0)),        # b2
                pl.BlockSpec((Sp, output), lambda i: (0, 0)),   # w3
                pl.BlockSpec((1, output), lambda i: (0, 0)),    # b3
            ],
            out_specs=pl.BlockSpec((tb, output), lambda i: (i, 0)),
        ),
        compiler_params=pltpu.CompilerParams(
            dimension_semantics=("parallel",),      # megacore on v7x
            vmem_limit_bytes=48 * 1024 * 1024,      # >32 MiB default, <64 MiB v7x
        ),
    )(x, w1t, b1p, w2t, b2p, w3t, b3p)


def init_params(key, states, output):
    """Deterministic init matching the PyTorch module's parameter shapes."""
    ks = jax.random.split(key, 6)
    hidden = states + 5

    def uniform(k, shape, fan_in):
        bound = 1.0 / jnp.sqrt(fan_in)
        return jax.random.uniform(k, shape, jnp.float32, -bound, bound)

    return {
        "w1": uniform(ks[0], (hidden, states), states),   # fc1.weight
        "b1": uniform(ks[1], (hidden,), states),          # fc1.bias
        "w2": uniform(ks[2], (states, hidden), hidden),   # fc2.weight
        "b2": uniform(ks[3], (states,), hidden),          # fc2.bias
        "w3": uniform(ks[4], (output, states), states),   # fc3.weight
        "b3": uniform(ks[5], (output,), states),          # fc3.bias
    }


def mlp_reference_f32(x, p):
    """Pure-f32 reference of the PyTorch forward."""
    h = jnp.maximum(x @ p["w1"].T + p["b1"], 0.0)
    h = jnp.maximum(h @ p["w2"].T + p["b2"], 0.0)
    return h @ p["w3"].T + p["b3"]


def mlp_reference_bf16(x, p):
    """Reference matching the kernel's numerics: bf16 operands, f32 accumulate."""
    bf = lambda a: a.astype(jnp.bfloat16).astype(jnp.float32)
    h = jnp.maximum(bf(x) @ bf(p["w1"].T) + p["b1"], 0.0)
    h = jnp.maximum(bf(h) @ bf(p["w2"].T) + p["b2"], 0.0)
    return bf(h) @ bf(p["w3"].T) + p["b3"]


if __name__ == "__main__":
    states, output, batch = 32, 8, 8

    key = jax.random.PRNGKey(0)
    k_x, k_p = jax.random.split(key)

    x = jax.random.normal(k_x, (batch, states), dtype=jnp.float32)
    params = init_params(k_p, states, output)

    prepared = prepare_params(params)          # one-time, outside the hot path
    out = mlp_forward(x, prepared)
    out = jax.block_until_ready(out)

    assert out.shape == (batch, output), out.shape

    # Tight check against a reference with the same bf16-operand numerics.
    ref_bf16 = mlp_reference_bf16(x, params)
    assert jnp.allclose(out, ref_bf16, atol=1e-3, rtol=1e-3), "mismatch (bf16 ref)"

    # Loose check against the full-f32 PyTorch-semantics reference
    # (bf16 MXU operands change results at ~1e-2 level by design).
    ref_f32 = mlp_reference_f32(x, params)
    assert jnp.allclose(out, ref_f32, atol=5e-2, rtol=5e-2), "mismatch (f32 ref)"

    print("KERNEL_OK")
</pallas_src>

<mosaic_0001>
module attributes {stable_mosaic.version = 11 : i64} {
  func.func @_mlp_kernel(%arg0: i32, %arg1: memref<8x32xf32, #tpu.memory_space<vmem>>, %arg2: memref<32x128xbf16, #tpu.memory_space<vmem>>, %arg3: memref<1x128xf32, #tpu.memory_space<vmem>>, %arg4: memref<128x128xbf16, #tpu.memory_space<vmem>>, %arg5: memref<1x128xf32, #tpu.memory_space<vmem>>, %arg6: memref<128x8xbf16, #tpu.memory_space<vmem>>, %arg7: memref<1x8xf32, #tpu.memory_space<vmem>>, %arg8: memref<8x8xf32, #tpu.memory_space<vmem>>) attributes {dimension_semantics = [#tpu.dimension_semantics<parallel>], iteration_bounds = array<i64: 1>, scalar_prefetch = 0 : i64, scratch_operands = 0 : i64, tpu.core_type = #tpu.core_type<tc>, window_params = [{transform_indices = @transform_0, window_bounds = array<i64: 8, 32>}, {pipeline_mode = #tpu.pipeline_mode<synchronous>, transform_indices = @transform_1, window_bounds = array<i64: 32, 128>}, {pipeline_mode = #tpu.pipeline_mode<synchronous>, transform_indices = @transform_2, window_bounds = array<i64: 1, 128>}, {pipeline_mode = #tpu.pipeline_mode<synchronous>, transform_indices = @transform_3, window_bounds = array<i64: 128, 128>}, {pipeline_mode = #tpu.pipeline_mode<synchronous>, transform_indices = @transform_4, window_bounds = array<i64: 1, 128>}, {pipeline_mode = #tpu.pipeline_mode<synchronous>, transform_indices = @transform_5, window_bounds = array<i64: 128, 8>}, {pipeline_mode = #tpu.pipeline_mode<synchronous>, transform_indices = @transform_6, window_bounds = array<i64: 1, 8>}, {transform_indices = @transform_7, window_bounds = array<i64: 8, 8>}]} {
    %c0 = arith.constant 0 : index
    %c0_0 = arith.constant 0 : index
    %0 = vector.load %arg1[%c0, %c0_0] : memref<8x32xf32, #tpu.memory_space<vmem>>, vector<8x32xf32>
    %1 = arith.truncf %0 : vector<8x32xf32> to vector<8x32xbf16>
    %c0_1 = arith.constant 0 : index
    %c0_2 = arith.constant 0 : index
    %2 = vector.load %arg2[%c0_1, %c0_2] : memref<32x128xbf16, #tpu.memory_space<vmem>>, vector<32x128xbf16>
    %cst = arith.constant dense<0.000000e+00> : vector<8x128xf32>
    %3 = tpu.matmul %1, %2, %cst {dimension_numbers = #tpu.dot_dimension_numbers<[1], [0], [0], [1], [0, 0, 1, 1], [], []>} : vector<8x32xbf16>, vector<32x128xbf16>, vector<8x128xf32> -> vector<8x128xf32>
    %c0_3 = arith.constant 0 : index
    %c0_4 = arith.constant 0 : index
    %4 = vector.load %arg3[%c0_3, %c0_4] : memref<1x128xf32, #tpu.memory_space<vmem>>, vector<1x128xf32>
    %5 = vector.broadcast %4 : vector<1x128xf32> to vector<8x128xf32>
    %6 = arith.addf %3, %5 : vector<8x128xf32>
    %cst_5 = arith.constant 0.000000e+00 : f32
    %7 = vector.broadcast %cst_5 : f32 to vector<8x128xf32>
    %8 = arith.maximumf %6, %7 : vector<8x128xf32>
    %9 = arith.truncf %8 : vector<8x128xf32> to vector<8x128xbf16>
    %c0_6 = arith.constant 0 : index
    %c0_7 = arith.constant 0 : index
    %10 = vector.load %arg4[%c0_6, %c0_7] : memref<128x128xbf16, #tpu.memory_space<vmem>>, vector<128x128xbf16>
    %cst_8 = arith.constant dense<0.000000e+00> : vector<8x128xf32>
    %11 = tpu.matmul %9, %10, %cst_8 {dimension_numbers = #tpu.dot_dimension_numbers<[1], [0], [0], [1], [0, 0, 1, 1], [], []>} : vector<8x128xbf16>, vector<128x128xbf16>, vector<8x128xf32> -> vector<8x128xf32>
    %c0_9 = arith.constant 0 : index
    %c0_10 = arith.constant 0 : index
    %12 = vector.load %arg5[%c0_9, %c0_10] : memref<1x128xf32, #tpu.memory_space<vmem>>, vector<1x128xf32>
    %13 = vector.broadcast %12 : vector<1x128xf32> to vector<8x128xf32>
    %14 = arith.addf %11, %13 : vector<8x128xf32>
    %cst_11 = arith.constant 0.000000e+00 : f32
    %15 = vector.broadcast %cst_11 : f32 to vector<8x128xf32>
    %16 = arith.maximumf %14, %15 : vector<8x128xf32>
    %17 = arith.truncf %16 : vector<8x128xf32> to vector<8x128xbf16>
    %c0_12 = arith.constant 0 : index
    %c0_13 = arith.constant 0 : index
    %18 = vector.load %arg6[%c0_12, %c0_13] : memref<128x8xbf16, #tpu.memory_space<vmem>>, vector<128x8xbf16>
    %cst_14 = arith.constant dense<0.000000e+00> : vector<8x8xf32>
    %19 = tpu.matmul %17, %18, %cst_14 {dimension_numbers = #tpu.dot_dimension_numbers<[1], [0], [0], [1], [0, 0, 1, 1], [], []>} : vector<8x128xbf16>, vector<128x8xbf16>, vector<8x8xf32> -> vector<8x8xf32>
    %c0_15 = arith.constant 0 : index
    %c0_16 = arith.constant 0 : index
    %20 = vector.load %arg7[%c0_15, %c0_16] : memref<1x8xf32, #tpu.memory_space<vmem>>, vector<1x8xf32>
    %21 = vector.broadcast %20 : vector<1x8xf32> to vector<8x8xf32>
    %22 = arith.addf %19, %21 : vector<8x8xf32>
    %c0_17 = arith.constant 0 : index
    %c0_18 = arith.constant 0 : index
    %23 = vector.load %arg8[%c0_17, %c0_18] : memref<8x8xf32, #tpu.memory_space<vmem>>, vector<8x8xf32>
    tpu.vector_store %arg8[%c0_17, %c0_18], %22 {strides = array<i32>} : memref<8x8xf32, #tpu.memory_space<vmem>>, vector<8x8xf32>,
    return
  }
  func.func @transform_0(%arg0: i32) -> (i32, i32) {
    %c0_i32 = arith.constant 0 : i32
    %c0_i32_0 = arith.constant 0 : i32
    return %arg0, %c0_i32 : i32, i32
  }
  func.func @transform_1(%arg0: i32) -> (i32, i32) {
    %c0_i32 = arith.constant 0 : i32
    %c0_i32_0 = arith.constant 0 : i32
    %c0_i32_1 = arith.constant 0 : i32
    return %c0_i32, %c0_i32_0 : i32, i32
  }
  func.func @transform_2(%arg0: i32) -> (i32, i32) {
    %c0_i32 = arith.constant 0 : i32
    %c0_i32_0 = arith.constant 0 : i32
    %c0_i32_1 = arith.constant 0 : i32
    return %c0_i32, %c0_i32_0 : i32, i32
  }
  func.func @transform_3(%arg0: i32) -> (i32, i32) {
    %c0_i32 = arith.constant 0 : i32
    %c0_i32_0 = arith.constant 0 : i32
    %c0_i32_1 = arith.constant 0 : i32
    return %c0_i32, %c0_i32_0 : i32, i32
  }
  func.func @transform_4(%arg0: i32) -> (i32, i32) {
    %c0_i32 = arith.constant 0 : i32
    %c0_i32_0 = arith.constant 0 : i32
    %c0_i32_1 = arith.constant 0 : i32
    return %c0_i32, %c0_i32_0 : i32, i32
  }
  func.func @transform_5(%arg0: i32) -> (i32, i32) {
    %c0_i32 = arith.constant 0 : i32
    %c0_i32_0 = arith.constant 0 : i32
    %c0_i32_1 = arith.constant 0 : i32
    return %c0_i32, %c0_i32_0 : i32, i32
  }
  func.func @transform_6(%arg0: i32) -> (i32, i32) {
    %c0_i32 = arith.constant 0 : i32
    %c0_i32_0 = arith.constant 0 : i32
    %c0_i32_1 = arith.constant 0 : i32
    return %c0_i32, %c0_i32_0 : i32, i32
  }
  func.func @transform_7(%arg0: i32) -> (i32, i32) {
    %c0_i32 = arith.constant 0 : i32
    %c0_i32_0 = arith.constant 0 : i32
    return %arg0, %c0_i32 : i32, i32
  }
}

</mosaic_0001>

<bundles_post_ra>
// kernel: mlp_forward.1
= control target key start
LH: loop header
LB: loop body
LE: loop exit
PB: predicated region body
PF: predicated region fallthrough
CT: control target
= control target key end

     0   :  { %12 = vsyncpa [#allocation3], 0  ;;  %s668_s0 = inlined_call_operand.hbm [shape: f32[8,32], index: 0, kind: input, shape index: {}]   ;;  %s669_s1 = inlined_call_operand.vmem [shape: bf16[32,128], index: 1, kind: input, shape index: {}]   ;;  %s670_s2 = inlined_call_operand.vmem [shape: f32[1,128], index: 2, kind: input, shape index: {}]   ;;  %s671_s3 = inlined_call_operand.vmem [shape: bf16[128,128], index: 3, kind: input, shape index: {}]   ;;  %s672_s4 = inlined_call_operand.vmem [shape: f32[1,128], index: 4, kind: input, shape index: {}]   ;;  %s673_s5 = inlined_call_operand.vmem [shape: bf16[128,8], index: 5, kind: input, shape index: {}]   ;;  %s674_s6 = inlined_call_operand.vmem [shape: f32[1,8], index: 6, kind: input, shape index: {}]   ;;  %s675_s7 = inlined_call_operand.hbm [shape: f32[8,8], index: 7, kind: output, shape index: {}]  }
   0x1   :  { %13 = vsyncpa [#allocation4], 0  ;;  %s513_s24 = smov [#allocation2]   ;;  %s465_s28 = scalar_lea.hbm %s668_s0, 128 }
   0x2   :  { %s20_s25 = sshll.u32 %s513_s24, 4  ;;  %p466_p0 = scmp.ne.s32.totalorder %s668_s0, %s465_s28  ;;  %s21_s25 = int_to_ptr.vmem [resolvable:$true] %s20_s25 }
   0x3   :  { %p469_p1 = scmp.lt.u32.totalorder %s465_s28, %s668_s0 }
   0x5   :  { %p471_p2 = pnand %p469_p1, %p466_p0 }
   0x7   :  { %474 = shalt.err (!%p471_p2)
}
   0x8   :  { %s475_s10 = scalar_lea.vmem %s21_s25, 128  ;;  %p480_p4 = scmp.lt.s32.totalorder %s21_s25, %s21_s25 }
   0x9   :  { %p476_p3 = scmp.ne.s32.totalorder %s21_s25, %s475_s10  ;;  %p481_p5 = scmp.lt.s32.totalorder %s475_s10, %s475_s10 }
   0xb   :  { %p482_p6 = por %p481_p5, %p480_p4 }
   0xd   :  { %p483_p7 = pnand %p482_p6, %p476_p3 }
   0xf   :  { %486 = shalt.err (!%p483_p7)
}
  0x10   :  { %23 = dma.hbm_to_vmem [thread:$0]  %s668_s0, 128, %s21_s25, [#allocation3]  }
  0x11   :  { %509 = dma.done.wait [#allocation3], 128  }
  0x12   :  { %510 = vsyncadd [#allocation3], 4294967168  ;;  %v514_v0 = vmov 0.0   ;;  %vm515_vm0 = vmmov 0   ;;  %v447_v1 = vld [vmem:[%s669_s1] sm:$0xff]   ;;  %v448_v2 = vld [vmem:[%s669_s1 + $0x8] sm:$0xff]  }
  0x13   :  { %395 = vmatprep.subr.bf16.mxu0 %v514_v0  ;;  %399 = vmatprep.mubr.msk.bf16.mxu0 %vm515_vm0, %v514_v0  ;;  %v40_v3 = vld [vmem:[#allocation2] sm:$0xff]  ;;  %v450_v6 = vld [vmem:[%s671_s3 + $0x8] sm:$0xff]   ;;  %vm65_vm1 = vcmask 261120   ;;  %v451_v7 = vld [vmem:[%s671_s3 + $0x10] sm:$0xff]   ;;  %s516_s26 = smov [#allocation5]   ;;  %vm335_vm2 = vcmask 64512  }
  0x14   :  { %403 = vmatprep.subr.bf16.mxu1 %v514_v0  ;;  %419 = vmatprep.mubr.msk.bf16.mxu1 %vm515_vm0, %v514_v0  ;;  %v449_v4 = vld [vmem:[%s671_s3] sm:$0xff]   ;;  %v41_v5 = vpack.c.bf16 %v40_v3, %v40_v3  ;;  %v452_v8 = vld [vmem:[%s671_s3 + $0x18] sm:$0xff]   ;;  %v454_v10 = vld [vmem:[%s671_s3 + $0x28] sm:$0xff]   ;;  %s343_s27 = sshll.u32 %s516_s26, 4  ;;  %s344_s27 = int_to_ptr.vmem [resolvable:$true] %s343_s27 }
  0x15   :  { %396 = vmatpush3.bf16.msra.mxu0 %v447_v1  ;;  %404 = vmatpush3.bf16.msra.mxu1 %v449_v4  ;;  %v453_v9 = vld [vmem:[%s671_s3 + $0x20] sm:$0xff]   ;;  %v455_v11 = vld [vmem:[%s671_s3 + $0x30] sm:$0xff]   ;;  %v456_v12 = vld [vmem:[%s671_s3 + $0x38] sm:$0xff]   ;;  %p492_p9 = scmp.lt.s32.totalorder %s344_s27, %s344_s27 }
  0x16   :  { %397 = vmatprep.subr.bf16.mxu0 %v514_v0  ;;  %405 = vmatprep.subr.bf16.mxu1 %v514_v0  ;;  %v457_v13 = vld [vmem:[%s673_s5] sm:$0xff]   ;;  %v458_v14 = vld [vmem:[%s673_s5 + $0x8] sm:$0xff]   ;;  %v459_v15 = vld [vmem:[%s673_s5 + $0x10] sm:$0xff]  }
  0x17   :  { %v460_v16 = vld [vmem:[%s673_s5 + $0x18] sm:$0xff]   ;;  %v461_v17 = vld [vmem:[%s673_s5 + $0x20] sm:$0xff]   ;;  %v462_v18 = vld [vmem:[%s673_s5 + $0x28] sm:$0xff]  }
  0x18   :  { %v352_v19 = vld [vmem:[%s670_s2] ss:$0 sm:$0xff]  ;;  %v463_v27 = vld [vmem:[%s673_s5 + $0x30] sm:$0xff]   ;;  %v464_v28 = vld [vmem:[%s673_s5 + $0x38] sm:$0xff]  }
  0x19   :  { %398 = vmatpush3.bf16.msra.mxu0 %v448_v2  ;;  %406 = vmatpush3.bf16.msra.mxu1 %v450_v6  ;;  %v356_v29 = vld [vmem:[%s672_s4] ss:$0 sm:$0xff]  ;;  %s487_s4 = scalar_lea.vmem %s344_s27, 128 }
  0x1a   :  { %423 = vmatprep.subr.bf16.mxu0 %v514_v0  ;;  %407 = vmatprep.subr.bf16.mxu1 %v514_v0  ;;  %v365_v37 = vld [vmem:[%s674_s6] ss:$0 sm:$0xff]  ;;  %p488_p8 = scmp.ne.s32.totalorder %s344_s27, %s487_s4  ;;  %p493_p10 = scmp.lt.s32.totalorder %s487_s4, %s487_s4 }
  0x1c   :  { %400 = vmatmul.mubr.msk.bf16.vlgmr.msra.gmra.mrb[0].mxu0 %vm65_vm1, %v41_v5  ;;  %p494_p11 = por %p493_p10, %p492_p9 }
  0x1d   :  { %439 = vmatprep.mubr.msk.bf16.mxu0 %vm515_vm0, %v514_v0  ;;  %408 = vmatpush3.bf16.msra.mxu1 %v451_v7 }
  0x1e   :  { %409 = vmatprep.subr.bf16.mxu1 %v514_v0  ;;  %424 = vmatpush3.bf16.msra.mxu0 %v457_v13  ;;  %p495_p12 = pnand %p494_p11, %p488_p8 }
  0x1f   :  { %425 = vmatprep.subr.bf16.mxu0 %v514_v0 }
  0x21   :  { %410 = vmatpush3.bf16.msra.mxu1 %v452_v8 }
  0x22   :  { %411 = vmatprep.subr.bf16.mxu1 %v514_v0  ;;  %426 = vmatpush3.bf16.msra.mxu0 %v458_v14 }
  0x23   :  { %427 = vmatprep.subr.bf16.mxu0 %v514_v0 }
  0x25   :  { %412 = vmatpush3.bf16.msra.mxu1 %v453_v9 }
  0x26   :  { %413 = vmatprep.subr.bf16.mxu1 %v514_v0  ;;  %428 = vmatpush3.bf16.msra.mxu0 %v459_v15 }
  0x27   :  { %429 = vmatprep.subr.bf16.mxu0 %v514_v0 }
  0x29   :  { %414 = vmatpush3.bf16.msra.mxu1 %v454_v10 }
  0x2a   :  { %415 = vmatprep.subr.bf16.mxu1 %v514_v0  ;;  %430 = vmatpush3.bf16.msra.mxu0 %v460_v16 }
  0x2b   :  { %431 = vmatprep.subr.bf16.mxu0 %v514_v0 }
  0x2d   :  { %416 = vmatpush3.bf16.msra.mxu1 %v455_v11 }
  0x2e   :  { %417 = vmatprep.subr.bf16.mxu1 %v514_v0  ;;  %432 = vmatpush3.bf16.msra.mxu0 %v461_v17 }
  0x2f   :  { %433 = vmatprep.subr.bf16.mxu0 %v514_v0 }
  0x31   :  { %418 = vmatpush3.bf16.msra.mxu1 %v456_v12 }
  0x32   :  { %434 = vmatpush3.bf16.msra.mxu0 %v462_v18 }
  0x33   :  { %435 = vmatprep.subr.bf16.mxu0 %v514_v0 }
  0x36   :  { %436 = vmatpush3.bf16.msra.mxu0 %v463_v27 }
  0x37   :  { %437 = vmatprep.subr.bf16.mxu0 %v514_v0 }
  0x3a   :  { %438 = vmatpush3.bf16.msra.mxu0 %v464_v28 }
  0xef   :  { %v103_v20 = vpop.f32.mrb[0].mxu0 }
  0xf0   :  { %v104_v21 = vadd.f32 %v352_v19, %v103_v20  ;;  %v401_v22 = vpop.f32.mrb[1].mxu0 }
  0xf1   :  { %v106_v23 = vpop.f32.mrb[2].mxu0 }
  0xf2   :  { %v109_v24 = vmax.f32 %v104_v21, 0.0  ;;  %v402_v25 = vpop.f32.mrb[3].mxu0 }
  0xf4   :  { %v110_v26 = vpack.c.bf16 %v109_v24, %v109_v24 }
  0xf6   :  { %420 = vmatmul.mubr.bf16.vlgmr.msra.gmra.mrb[0].mxu1 %v110_v26 }
 0x1c9   :  { %v216_v30 = vpop.f32.mrb[0].mxu1 }
 0x1ca   :  { %v217_v31 = vadd.f32 %v356_v29, %v216_v30  ;;  %v421_v32 = vpop.f32.mrb[1].mxu1 }
 0x1cb   :  { %v219_v33 = vpop.f32.mrb[2].mxu1 }
 0x1cc   :  { %v222_v34 = vmax.f32 %v217_v31, 0.0  ;;  %v422_v35 = vpop.f32.mrb[3].mxu1 }
 0x1ce   :  { %v223_v36 = vpack.c.bf16 %v222_v34, %v222_v34 }
 0x1d0   :  { %440 = vmatmul.mubr.bf16.vlgmr.msra.gmra.mrb[4].mxu0 %v223_v36 }
 0x2a3   :  { %v329_v38 = vpop.f32.mrb[4].mxu0 }
 0x2a4   :  { %v330_v39 = vadd.f32 %v365_v37, %v329_v38  ;;  %v441_v40 = vpop.f32.mrb[5].mxu0 }
 0x2a5   :  { %v332_v41 = vpop.f32.mrb[6].mxu0 }
 0x2a6   :  { %v442_v42 = vpop.f32.mrb[7].mxu0  ;;  %336 = vst.msk [vmem:[#allocation5] sm:$0xff] %vm335_vm2, %v330_v39 }
 0x2a7   :  { %498 = shalt.err (!%p495_p12)
}
 0x2a8   :  { %s499_s6 = scalar_lea.hbm %s675_s7, 128 }
 0x2a9   :  { %p500_p13 = scmp.ne.s32.totalorder %s675_s7, %s499_s6  ;;  %p503_p0 = scmp.lt.u32.totalorder %s499_s6, %s675_s7 }
 0x2ab   :  { %p505_p1 = pnand %p503_p0, %p500_p13 }
 0x2ad   :  { %508 = shalt.err (!%p505_p1)
}
 0x2ae   :  { %346 = dma.vmem_to_hbm [thread:$0]  %s344_s27, 128, %s675_s7, [#allocation4]  }
 0x2af   :  { %511 = dma.done.wait [#allocation4], 128  }
 0x2b0   :  { %512 = vsyncadd [#allocation4], 4294967168 }
 0x2b1   :  { %350 = vsyncpa [#allocation3], 1 }
 0x2b2   :  { %351 = vsyncpa [#allocation4], 1 }

</bundles_post_ra>
